<compile_context>
chip_gen: v5e
topology: v5e:2x2
jax: 0.10.0
libtpu: 0.0.40
codegen_flags: <defaults>
</compile_context>

<pallas_src>
import functools
import math

import jax
import jax.numpy as jnp
from jax.experimental import pallas as pl
from jax.experimental.pallas import tpu as pltpu


def _norm_kernel(x_ref, alpha_ref, bias_ref, o_ref, *, eps):
    # x_ref: (tile_rows, D); alpha_ref / bias_ref: (1, D), already f32.
    # f32 compute path on purpose: v5e has no bf16 VALU/EUP, and the kernel is
    # HBM-bound on v5e/v6e anyway, so the casts are hidden.
    x = x_ref[...].astype(jnp.float32)
    d = x.shape[-1]
    mean = jnp.mean(x, axis=-1, keepdims=True)            # XLU cross-lane reduce
    xc = x - mean
    # torch.std default is the unbiased estimator (ddof=1); d==1 -> NaN, which
    # matches torch.std semantics.
    inv_dof = jnp.float32(1.0 / (d - 1)) if d > 1 else jnp.float32(jnp.nan)
    var = jnp.sum(xc * xc, axis=-1, keepdims=True) * inv_dof
    std = jnp.sqrt(var)
    # Exact per-row reciprocal: operates only on a (tile_rows, 1) vector so it
    # is essentially free, and keeps full parity with PyTorch's exact division
    # (approx=True's ~1e-3 relative error failed the tolerance check).
    inv = jnp.float32(1.0) / (std + jnp.float32(eps))
    out = xc * inv * alpha_ref[...] + bias_ref[...]
    o_ref[...] = out.astype(o_ref.dtype)
    # NOTE: the ragged last tile computes on padded/stale rows; this is safe
    # only because every row is independent (no cross-row reductions).
    # TODO(synk): on v7x with bf16 inputs, offload the two row reductions to
    # the idle MXU (dot with a bf16 ones matrix, f32 accumulate) to relieve
    # the VALU slot; kept on the VPU/XLU path here for f32 precision parity.


def _round_up(x, m):
    return ((x + m - 1) // m) * m


def _vmem_policy():
    """(per-step block budget bytes, scoped-VMEM limit bytes), generation-aware."""
    vmem_cap = None
    try:
        vmem_cap = pltpu.get_tpu_info().vmem_capacity_bytes
    except Exception:
        vmem_cap = None  # interpret mode / unknown device -> stay conservative
    if vmem_cap is not None and vmem_cap >= 128 * 1024 * 1024:
        # v5e / v6e: 128 MiB physical VMEM.  Bigger blocks = fewer grid steps
        # and longer DMAs on the most HBM-bound chips.
        return 28 * 1024 * 1024, 64 * 1024 * 1024
    # v7x (64 MiB physical, 32 MiB scoped default) or unknown backend.
    return 12 * 1024 * 1024, 32 * 1024 * 1024


def _choose_tile_rows(rows, d, itemsize, sublane, budget_bytes, requested=None):
    """Largest row tile whose live VMEM fits the budget (no hard row cap)."""
    rows_padded = _round_up(max(rows, 1), sublane)
    if requested is not None:
        t = max(sublane, _round_up(int(requested), sublane))
        return min(t, rows_padded)
    # Live VMEM per step ~= 2x double-buffered (input + output) blocks plus the
    # ~3 full f32 intermediates (x, xc, out) the body materializes (~16 B/elem
    # with headroom).  This accounting avoids the bf16-on-v7x spill/OOM cliff.
    bytes_per_row = d * (4 * itemsize + 16)
    t = max(sublane, (budget_bytes // bytes_per_row) // sublane * sublane)
    # Keep the grid at >= ~4 steps when rows allow it: the "parallel" row axis
    # then shards across both v7x TensorCores and double-buffering has steps
    # to overlap (also helps pipelining on v5e/v6e).
    t = min(t, max(sublane, _round_up(pl.cdiv(rows, 4), sublane)))
    return min(t, rows_padded)


def pallas_norm(x, alpha, bias, eps=1e-6, tile_rows=None, vmem_limit_bytes=None):
    """Norm over the last axis of x.  x: (..., D), alpha/bias: (D,)."""
    orig_shape = x.shape
    d = orig_shape[-1]
    rows = math.prod(orig_shape[:-1]) if len(orig_shape) > 1 else 1
    x2 = x.reshape(rows, d)

    itemsize = jnp.dtype(x.dtype).itemsize
    sublane = max(8, 32 // itemsize)          # 8 for f32, 16 for bf16, 32 for int8

    budget_bytes, auto_limit = _vmem_policy()
    if vmem_limit_bytes is None:
        vmem_limit_bytes = auto_limit
    tr = _choose_tile_rows(rows, d, itemsize, sublane, budget_bytes, tile_rows)

    # Parameters cast to f32 once in the wrapper (no per-grid-step casts).
    alpha2 = alpha.reshape(1, d).astype(jnp.float32)
    bias2 = bias.reshape(1, d).astype(jnp.float32)

    # Ragged last tile is handled by Pallas (per-row math is independent; OOB
    # output rows are discarded).  No host-side pad -> no extra HBM copy of x.
    grid = (pl.cdiv(rows, tr),)

    # TODO(synk): for production d_model < 128 (or not a multiple of 128), pack
    # 128//D rows per lane row so output stores are lane-dense (avoids masked
    # vst.msk partial stores); not needed for typical transformer d_model.
    out = pl.pallas_call(
        functools.partial(_norm_kernel, eps=eps),
        out_shape=jax.ShapeDtypeStruct((rows, d), x.dtype),
        grid_spec=pltpu.PrefetchScalarGridSpec(
            num_scalar_prefetch=0,
            grid=grid,
            in_specs=[
                pl.BlockSpec((tr, d), lambda i: (i, 0)),
                pl.BlockSpec((1, d), lambda i: (0, 0)),
                pl.BlockSpec((1, d), lambda i: (0, 0)),
            ],
            out_specs=pl.BlockSpec((tr, d), lambda i: (i, 0)),
        ),
        compiler_params=pltpu.CompilerParams(
            dimension_semantics=("parallel",),      # megacore shards the row axis
            vmem_limit_bytes=vmem_limit_bytes,      # generation-aware scoped limit
        ),
    )(x2, alpha2, bias2)

    return out.reshape(orig_shape)


def _reference_norm(x, alpha, bias, eps=1e-6):
    # Pure-JAX reference replicating the PyTorch forward (torch.std unbiased).
    mean = jnp.mean(x, axis=-1, keepdims=True)
    xc = x - mean
    d = x.shape[-1]
    std = jnp.sqrt(jnp.sum(xc * xc, axis=-1, keepdims=True) / (d - 1))
    return alpha * xc / (std + eps) + bias


if __name__ == "__main__":
    key = jax.random.PRNGKey(0)

    # (shape, dtype, explicit tile_rows or None, tolerance)
    cases = [
        ((2, 8, 128), jnp.float32, None, 2e-3),   # lane-dense d_model
        ((2, 8, 32), jnp.float32, None, 2e-3),    # small d_model (correctness path)
        ((2, 333, 128), jnp.float32, 64, 2e-3),   # multi-step grid + ragged last tile
        ((2, 8, 128), jnp.bfloat16, None, 5e-2),  # bf16 activations
    ]

    for shape, dtype, tr, tol in cases:
        d = shape[-1]
        key, k1, k2, k3 = jax.random.split(key, 4)
        x = jax.random.normal(k1, shape, dtype=jnp.float32).astype(dtype)
        # Non-trivial (learnable) parameters to exercise broadcasting; the
        # module's __init__ values are alpha=ones, bias=zeros.
        alpha = 1.0 + 0.1 * jax.random.normal(k2, (d,), dtype=jnp.float32)
        bias = 0.1 * jax.random.normal(k3, (d,), dtype=jnp.float32)

        out = pallas_norm(x, alpha, bias, eps=1e-6, tile_rows=tr)
        out = jax.block_until_ready(out)

        ref = _reference_norm(x.astype(jnp.float32), alpha, bias, eps=1e-6)
        assert out.shape == x.shape and out.dtype == x.dtype
        assert jnp.allclose(out.astype(jnp.float32), ref, atol=tol, rtol=tol), shape

    print("KERNEL_OK")
</pallas_src>

<mosaic_0001>
module attributes {stable_mosaic.version = 11 : i64} {
  func.func @_norm_kernel(%arg0: i32, %arg1: memref<8x128xf32, #tpu.memory_space<vmem>>, %arg2: memref<1x128xf32, #tpu.memory_space<vmem>>, %arg3: memref<1x128xf32, #tpu.memory_space<vmem>>, %arg4: memref<8x128xf32, #tpu.memory_space<vmem>>) attributes {dimension_semantics = [#tpu.dimension_semantics<parallel>], iteration_bounds = array<i64: 2>, scalar_prefetch = 0 : i64, scratch_operands = 0 : i64, tpu.core_type = #tpu.core_type<tc>, window_params = [{transform_indices = @transform_0, window_bounds = array<i64: 8, 128>}, {pipeline_mode = #tpu.pipeline_mode<synchronous>, transform_indices = @transform_1, window_bounds = array<i64: 1, 128>}, {pipeline_mode = #tpu.pipeline_mode<synchronous>, transform_indices = @transform_2, window_bounds = array<i64: 1, 128>}, {transform_indices = @transform_3, window_bounds = array<i64: 8, 128>}]} {
    %c0 = arith.constant 0 : index
    %c0_0 = arith.constant 0 : index
    %0 = vector.load %arg1[%c0, %c0_0] : memref<8x128xf32, #tpu.memory_space<vmem>>, vector<8x128xf32>
    %cst = arith.constant dense<0.000000e+00> : vector<8xf32>
    %1 = vector.multi_reduction <add>, %0, %cst [1] : vector<8x128xf32> to vector<8xf32>
    %2 = vector.shape_cast %1 : vector<8xf32> to vector<8x1xf32>
    %cst_1 = arith.constant 1.280000e+02 : f32
    %3 = vector.broadcast %cst_1 : f32 to vector<8x1xf32>
    %4 = arith.divf %2, %3 : vector<8x1xf32>
    %5 = vector.broadcast %4 : vector<8x1xf32> to vector<8x128xf32>
    %6 = arith.subf %0, %5 : vector<8x128xf32>
    %7 = arith.mulf %6, %6 : vector<8x128xf32>
    %cst_2 = arith.constant dense<0.000000e+00> : vector<8xf32>
    %8 = vector.multi_reduction <add>, %7, %cst_2 [1] : vector<8x128xf32> to vector<8xf32>
    %9 = vector.shape_cast %8 : vector<8xf32> to vector<8x1xf32>
    %cst_3 = arith.constant 0.00787401571 : f32
    %10 = vector.broadcast %cst_3 : f32 to vector<8x1xf32>
    %11 = arith.mulf %9, %10 : vector<8x1xf32>
    %12 = math.sqrt %11 : vector<8x1xf32>
    %cst_4 = arith.constant 9.99999997E-7 : f32
    %13 = vector.broadcast %cst_4 : f32 to vector<8x1xf32>
    %14 = arith.addf %12, %13 : vector<8x1xf32>
    %cst_5 = arith.constant 1.000000e+00 : f32
    %15 = vector.broadcast %cst_5 : f32 to vector<8x1xf32>
    %16 = arith.divf %15, %14 : vector<8x1xf32>
    %17 = vector.broadcast %16 : vector<8x1xf32> to vector<8x128xf32>
    %18 = arith.mulf %6, %17 : vector<8x128xf32>
    %c0_6 = arith.constant 0 : index
    %c0_7 = arith.constant 0 : index
    %19 = vector.load %arg2[%c0_6, %c0_7] : memref<1x128xf32, #tpu.memory_space<vmem>>, vector<1x128xf32>
    %20 = vector.broadcast %19 : vector<1x128xf32> to vector<8x128xf32>
    %21 = arith.mulf %18, %20 : vector<8x128xf32>
    %c0_8 = arith.constant 0 : index
    %c0_9 = arith.constant 0 : index
    %22 = vector.load %arg3[%c0_8, %c0_9] : memref<1x128xf32, #tpu.memory_space<vmem>>, vector<1x128xf32>
    %23 = vector.broadcast %22 : vector<1x128xf32> to vector<8x128xf32>
    %24 = arith.addf %21, %23 : vector<8x128xf32>
    %c0_10 = arith.constant 0 : index
    %c0_11 = arith.constant 0 : index
    %25 = vector.load %arg4[%c0_10, %c0_11] : memref<8x128xf32, #tpu.memory_space<vmem>>, vector<8x128xf32>
    tpu.vector_store %arg4[%c0_10, %c0_11], %24 {strides = array<i32>} : memref<8x128xf32, #tpu.memory_space<vmem>>, vector<8x128xf32>,
    return
  }
  func.func @transform_0(%arg0: i32) -> (i32, i32) {
    %c0_i32 = arith.constant 0 : i32
    %c0_i32_0 = arith.constant 0 : i32
    return %arg0, %c0_i32 : i32, i32
  }
  func.func @transform_1(%arg0: i32) -> (i32, i32) {
    %c0_i32 = arith.constant 0 : i32
    %c0_i32_0 = arith.constant 0 : i32
    %c0_i32_1 = arith.constant 0 : i32
    return %c0_i32, %c0_i32_0 : i32, i32
  }
  func.func @transform_2(%arg0: i32) -> (i32, i32) {
    %c0_i32 = arith.constant 0 : i32
    %c0_i32_0 = arith.constant 0 : i32
    %c0_i32_1 = arith.constant 0 : i32
    return %c0_i32, %c0_i32_0 : i32, i32
  }
  func.func @transform_3(%arg0: i32) -> (i32, i32) {
    %c0_i32 = arith.constant 0 : i32
    %c0_i32_0 = arith.constant 0 : i32
    return %arg0, %c0_i32 : i32, i32
  }
}

</mosaic_0001>

<bundles_post_ra>
// kernel: tpu_custom_call.1
= control target key start
LH: loop header
LB: loop body
LE: loop exit
PB: predicated region body
PF: predicated region fallthrough
CT: control target
= control target key end

     0   :  { %8 = vsyncpa [#allocation3], 0  ;;  %s734_s0 = inlined_call_operand.hbm [shape: f32[16,128], index: 0, kind: input, shape index: {}]   ;;  %s735_s1 = inlined_call_operand.hbm [shape: f32[1,128], index: 1, kind: input, shape index: {}]   ;;  %s736_s2 = inlined_call_operand.vmem [shape: f32[1,128], index: 2, kind: input, shape index: {}]   ;;  %s737_s3 = inlined_call_operand.hbm [shape: f32[16,128], index: 3, kind: output, shape index: {}]  }
   0x1   :  { %10 = vsyncpa [#allocation3 + $0x1], 0 }
   0x2   :  { %11 = vsyncpa [#allocation6], 0 }
   0x3   :  { %12 = vsyncpa [#allocation4], 0 }
   0x4   :  { %14 = vsyncpa [#allocation4 + $0x1], 0  ;;  %s589_s12 = smov 0   ;;  %s591_s13 = smov 0  }
   0x5   :  { %s593_s14 = smov 0   ;;  %s595_s15 = smov 0  }
   0x6 LB: > { %s610_s16 = sadd.s32 4294967295, %s565_s15   ;;  %s355_s17 = sadd.s32 4294967294, %s565_s15   ;;  %s565_s15 = sphi %s595_s15, %s747_s15   ;;  %s561_s14 = sphi %s593_s14, %s746_s14   ;;  %s557_s13 = sphi %s591_s13, %s745_s13   ;;  %s553_s12 = sphi %s589_s12, %s744_s12  }
   0x7   : > { %p40_p0 = scmp.ne.s32.totalorder %s557_s13, %s553_s12  ;;  %p41_p1 = scmp.eq.s32.totalorder %s610_s16, 0 }
   0x8   : > { %p106_p2 = scmp.eq.s32.totalorder %s610_s16, 1  ;;  %p112_p3 = scmp.eq.s32.totalorder %s355_s17, 1 }
   0x9   : > { %p619_p4 = por %p41_p1, %p40_p0  ;;  %p356_p5 = scmp.ge.s32.totalorder %s565_s15, 1 }
   0xa   : > { %p624_p6 = por %p112_p3, %p40_p0  ;;  %p119_p7 = scmp.lt.s32.totalorder %s565_s15, 3 }
   0xb   : > { %s131_s22 = sshll.u32 %s735_s1, 4  ;;  %s567_s24 = smov [#allocation5]   ;;  %s132_s22 = int_to_ptr.hbm [resolvable:$true] %s131_s22 }
   0xc   : > { %p632_p8 = pnand %p356_p5, %p119_p7  ;;  %s133_s25 = sshll.u32 %s567_s24, 4  ;;  %s134_s25 = int_to_ptr.vmem [resolvable:$true] %s133_s25 }
   0xd   : > { %s642_s26 = sadd.s32 1, %s565_s15   ;;  %s27_s27 = sadd.s32 1, %s561_s14 }
   0xe   : > { %p377_p10 = pneg %p632_p8  ;;  %s24_s28 = ssub.s32 %s565_s15, %s642_s26 }
   0xf   : > { %p25_p12 = scmp.eq.s32.totalorder %s24_s28, 0  ;;  %p34_p13 = scmp.ne.s32.totalorder %s561_s14, %s557_s13 }
  0x10   : > { %p378_p11 = pnand %p377_p10, %p41_p1  ;;  %p35_p0 = scmp.eq.s32.totalorder %s565_s15, 0 }
  0x11   : > { %s651_s29 = scalar_select %p25_p12, %s561_s14, %s27_s27  }
  0x12   : > { %380 = dma.hbm_to_vmem [thread:$0]  (!%p378_p11), %s132_s22, 16, %s134_s25, [#allocation6]  }
  0x13   : > { %p655_p3 = por %p106_p2, %p34_p13  ;;  %p390_p5 = scmp.lt.s32.totalorder %s565_s15, 2 }
  0x14   : > { %s147_s4 = sand.u32 1, %s561_s14   ;;  %s360_s5 = sshll.u32 %s565_s15, 3 }
  0x15   : > { %p36_p7 = por %p35_p0, %p34_p13  ;;  %s359_s6 = sshll.u32 %s147_s4, 3 }
  0x16   : > { %s155_s9 = scalar_lea.hbm %s734_s0, %s360_s5  ;;  %s151_s11 = scalar_lea.vmem [#allocation2], %s359_s6 }
  0x17   : > { %s157_s10 = sshll.u32 %s155_s9, 4  ;;  %s159_s17 = sshll.u32 %s151_s11, 4  ;;  %s158_s10 = int_to_ptr.hbm [resolvable:$true] %s157_s10  ;;  %s160_s17 = int_to_ptr.vmem [resolvable:$true] %s159_s17 }
  0x18   : > { %p665_p10 = pnand %p390_p5, %p36_p7  ;;  %s148_s21 = scalar_lea.sflag [#allocation3], %s147_s4 }
  0x19   : > { %s465_s22 = sshra.s32 %s158_s10, 4  ;;  %s472_s28 = scalar_lea.hbm %s734_s0, 16  ;;  %s466_s22 = int_to_ptr.hbm [resolvable:$true] %s465_s22 }
  0x1a   : > { %s467_s24 = scalar_lea.hbm %s466_s22, 8  ;;  %p469_p11 = pneg %p665_p10 }
  0x1b   : > { %p468_p2 = scmp.ne.s32.totalorder %s466_s22, %s467_s24  ;;  %p473_p0 = scmp.lt.s32.totalorder %s466_s22, %s734_s0 }
  0x1c   : > { %p474_p5 = scmp.lt.s32.totalorder %s472_s28, %s467_s24 }
  0x1d   : > { %p470_p12 = pnand %p469_p11, %p468_p2 }
  0x1e   : > { %p475_p7 = por %p474_p5, %p473_p0 }
  0x1f   : > { %p471_p13 = pneg %p470_p12 }
  0x21   : > { %p476_p9 = pnand %p475_p7, %p471_p13 }
  0x23   : > { %479 = shalt.err (!%p476_p9)
}
  0x24   : > { %384 = dma.hbm_to_vmem [thread:$0]  (!%p665_p10), %s158_s10, 128, %s160_s17, %s148_s21  }
  0x25   : > { %168 = sbr.rel (%p632_p8) target bundleno = 335 (0x14f), region = 32  ;;  %s682_s4 = sand.u32 (!%p632_p8), 1, %s557_s13  }
  0x26   : > { %s362_s7 = sshll.u32 (!%p632_p8), %s682_s4, 3  ;;  %s171_s8 = scalar_lea.sflag (!%p632_p8), [#allocation3], %s682_s4 }
  0x27   : > { %s174_s9 = scalar_lea.vmem (!%p632_p8), [#allocation2], %s362_s7 }
  0x2a   : > { %540 = dma.done.wait (%p619_p4), %s171_s8, 128  }
  0x2b   : > { %542 = vsyncadd (%p619_p4), %s171_s8, 4294967168 }
  0x2c   : > { %544 = dma.done.wait (%p41_p1), [#allocation6], 16  }
  0x2d   : > { %546 = vsyncadd (%p41_p1), [#allocation6], 4294967280  ;;  %v203_v0 = vld [vmem:[%s174_s9] sm:$0xff]  ;;  %v568_v1 = vmov 128.0   ;;  %s366_s18 = sshll.u32 %s610_s16, 3  ;;  %s202_s16 = scalar_lea.vmem [#allocation7], %s362_s7 }
  0x2e   : > { %204 = vadd.xlane.f32.xlu0 %v203_v0  ;;  %429 = vrcp.f32 %v568_v1  ;;  %v427_v34 = vld [vmem:[#allocation5] ss:$0 sm:$0xff]  ;;  %s270_s11 = scalar_lea.hbm %s737_s3, %s366_s18  ;;  %v428_v37 = vld [vmem:[%s736_s2] ss:$0 sm:$0xff]  ;;  %s272_s21 = sshll.u32 %s202_s16, 4  ;;  %s273_s21 = int_to_ptr.vmem [resolvable:$true] %s272_s21 }
  0x2f   : > { %s274_s22 = sshll.u32 %s270_s11, 4  ;;  %s260_s24 = scalar_lea.sflag [#allocation4], %s682_s4  ;;  %s275_s22 = int_to_ptr.hbm [resolvable:$true] %s274_s22 }
  0x30   : > { %s509_s25 = sshra.s32 %s275_s22, 4  ;;  %s515_s6 = scalar_lea.hbm %s737_s3, 16  ;;  %s510_s25 = int_to_ptr.hbm [resolvable:$true] %s509_s25 }
  0x31   : > { %s511_s27 = scalar_lea.hbm %s510_s25, 8  ;;  %p516_p9 = scmp.lt.s32.totalorder %s510_s25, %s737_s3 }
  0x32   : > { %p512_p1 = scmp.ne.s32.totalorder %s510_s25, %s511_s27  ;;  %p517_p10 = scmp.lt.s32.totalorder %s515_s6, %s511_s27 }
  0x34   : > { %v430_v2 = vpop.eup %429  ;;  %p513_p4 = pnand %p512_p1, %p655_p3  ;;  %p518_p2 = por %p517_p10, %p516_p9 }
  0x35   : > { %v207_v3 = vmul.f32 128.0, %v430_v2  ;;  %vm211_vm0 = vweird.f32 %v430_v2 }
  0x36   : > { %p514_p8 = pneg %p513_p4 }
  0x37   : > { %v208_v4 = vsub.f32 1.0, %v207_v3 }
  0x38   : > { %p519_p11 = pnand %p518_p2, %p514_p8 }
  0x39   : > { %v209_v5 = vmul.f32 %v430_v2, %v208_v4 }
  0x3b   : > { %v210_v6 = vadd.f32 %v430_v2, %v209_v5 }
  0x3d   : > { %v212_v7 = vsel %vm211_vm0, %v430_v2, %v210_v6 }
  0xa1   : > { %v205_v8 = vpop.xlane.xlu0 %204 }
  0xa2   : > { %v213_v9 = vmul.f32 %v212_v7, %v205_v8 }
  0xa4   : > { %v214_v10 = vsub.f32 %v203_v0, %v213_v9 }
  0xa6   : > { %v215_v11 = vmul.f32 %v214_v10, %v214_v10 }
  0xa8   : > { %216 = vadd.xlane.f32.xlu0 %v215_v11 }
 0x11b   : > { %v217_v12 = vpop.xlane.xlu0 %216 }
 0x11c   : > { %v218_v13 = vmul.f32 0.007874016, %v217_v12 }
 0x11e   : > { %431 = vrsqrt.f32 %v218_v13  ;;  %vm226_vm1 = vcmp.eq.f32.partialorder %v218_v13, inf  ;;  %v229_v21 = vand.u32 2147483648, %v218_v13  ;;  %vm228_vm2 = vcmp.eq.f32.partialorder %v218_v13, 0.0 }
 0x124   : > { %v432_v14 = vpop.eup %431 }
 0x125   : > { %v220_v15 = vmul.f32 %v432_v14, %v218_v13 }
 0x127   : > { %v221_v16 = vmul.f32 %v432_v14, %v220_v15 }
 0x129   : > { %v222_v17 = vmul.f32 0.5, %v221_v16 }
 0x12b   : > { %v223_v18 = vsub.f32 1.5, %v222_v17 }
 0x12d   : > { %v224_v19 = vmul.f32 %v432_v14, %v223_v18 }
 0x12f   : > { %v225_v20 = vmul.f32 %v224_v19, %v218_v13 }
 0x131   : > { %v227_v22 = vsel %vm226_vm1, %v218_v13, %v225_v20 }
 0x132   : > { %v230_v23 = vsel %vm228_vm2, %v229_v21, %v227_v22 }
 0x133   : > { %v231_v24 = vadd.f32 1e-06, %v230_v23 }
 0x135   : > { %433 = vrcp.f32 %v231_v24  ;;  %v243_v28 = vand.u32 2147483648, %v231_v24  ;;  %v241_v30 = vand.u32 2147483647, %v231_v24  ;;  %vm237_vm4 = vweird.f32 %v231_v24 }
 0x137   : > { %v244_v32 = vor.u32 1.1754944e-38, %v243_v28  ;;  %vm242_vm6 = vcmp.eq.f32.partialorder %v241_v30, 8.507059e+37 }
 0x13b   : > { %v434_v25 = vpop.eup %433 }
 0x13c   : > { %v233_v26 = vmul.f32 %v434_v25, %v231_v24  ;;  %vm238_vm3 = vweird.f32 %v434_v25 }
 0x13d   : > { %vm239_vm5 = vmor %vm237_vm4, %vm238_vm3 }
 0x13e   : > { %v234_v27 = vsub.f32 1.0, %v233_v26 }
 0x140   : > { %v235_v29 = vmul.f32 %v434_v25, %v234_v27 }
 0x142   : > { %v236_v31 = vadd.f32 %v434_v25, %v235_v29 }
 0x144   : > { %v240_v33 = vsel %vm239_vm5, %v434_v25, %v236_v31 }
 0x145   : > { %v245_v35 = vsel %vm242_vm6, %v244_v32, %v240_v33 }
 0x146   : > { %v247_v36 = vmul.f32 %v245_v35, %v214_v10 }
 0x148   : > { %v252_v38 = vmul.f32 %v427_v34, %v247_v36 }
 0x14a   : > { %v257_v39 = vadd.f32 %v428_v37, %v252_v38 }
 0x14c   : > { %258 = vst [vmem:[%s202_s16] sm:$0xff] %v257_v39 }
 0x14d   : > { %522 = shalt.err (!%p519_p11)
}
 0x14e   : > { %375 = dma.vmem_to_hbm [thread:$0]  (%p655_p3), %s273_s21, 128, %s275_s22, %s260_s24  }
 0x14f PF: > { %s286_s4 = sand.u32 1, %s553_s12   ;;  %p743_p12 = scmp.ge.s32.totalorder %s565_s15, 2 }
 0x150   : > { %s287_s9 = scalar_lea.sflag [#allocation4], %s286_s4 }
 0x151   : > { %p386_p13 = pnand %p743_p12, %p624_p6 }
 0x153   : > { %p387_p0 = pneg %p386_p13 }
 0x155   : > { %548 = dma.done.wait (%p387_p0), %s287_s9, 128  }
 0x156   : > { %550 = vsyncadd (%p387_p0), %s287_s9, 4294967168  ;;  %p17_p5 = scmp.ge.s32.totalorder %s642_s26, 4   ;;  %s744_s12 = smov %s557_s13 }
 0x157   : > { %s745_s13 = smov %s561_s14  ;;  %s746_s14 = smov %s651_s29 }
 0x158   : > { %s747_s15 = smov %s642_s26  ;;  %19 = sbr.rel (!%p17_p5) target bundleno = 6 (0x6), region = 81 }
 0x15d   :  { %293 = vsyncpa [#allocation3], 1 }
 0x15e   :  { %295 = vsyncpa [#allocation3 + $0x1], 1 }
 0x15f   :  { %296 = vsyncpa [#allocation6], 1 }
 0x160   :  { %297 = vsyncpa [#allocation4], 1 }
 0x161   :  { %299 = vsyncpa [#allocation4 + $0x1], 1 }

</bundles_post_ra>
